<compile_context>
chip_gen: v7x
topology: tpu7x:2x2x1
jax: 0.10.0
libtpu: 0.0.40
codegen_flags: <defaults>
</compile_context>

<pallas_src>
import functools

import jax
import jax.numpy as jnp
from jax.experimental import pallas as pl
from jax.experimental.pallas import tpu as pltpu

HIDDEN = 256
MAX_TB = 2048       # max batch-tile rows (per-step VMEM ~6 MB at this size)
SUBLANE = 8


def _round_up(x, m):
    return ((x + m - 1) // m) * m


def _make_actor_kernel(max_action: float):
    def actor_kernel(x_ref, w1_ref, b1_ref, w2_ref, b2_ref, w3_ref, b3_ref, o_ref):
        # activations in bf16 (native MXU rate), accumulate in f32
        x = x_ref[...].astype(jnp.bfloat16)

        # layer 1: Linear(state_dim, 256) + ReLU
        h1 = jnp.dot(x, w1_ref[...], preferred_element_type=jnp.float32) + b1_ref[...]
        h1 = jnp.maximum(h1, 0.0).astype(jnp.bfloat16)

        # layer 2: Linear(256, 256) + ReLU
        h2 = jnp.dot(h1, w2_ref[...], preferred_element_type=jnp.float32) + b2_ref[...]
        h2 = jnp.maximum(h2, 0.0).astype(jnp.bfloat16)

        # layer 3: Linear(256, action_dim), then max_action * tanh
        h3 = jnp.dot(h2, w3_ref[...], preferred_element_type=jnp.float32) + b3_ref[...]
        o_ref[...] = (max_action * jnp.tanh(h3)).astype(o_ref.dtype)

    return actor_kernel


def _actor_forward_impl(state, params, max_action):
    """state: [B, state_dim] f32 -> [B, action_dim] f32."""
    w1, b1, w2, b2, w3, b3 = params
    B, state_dim = state.shape
    action_dim = w3.shape[1]

    # --- tiling: pick tile count first, then derive tb (keeps padding < 8 rows/tile)
    min_tiles = 2 if B > SUBLANE else 1          # >=2 steps -> both v7x TCs busy
    n_tiles = max(min_tiles, (B + MAX_TB - 1) // MAX_TB)
    tb = _round_up((B + n_tiles - 1) // n_tiles, SUBLANE)
    Bp = n_tiles * tb
    if Bp != B:
        state = jnp.pad(state, ((0, Bp - B), (0, 0)))

    grid = (n_tiles,)
    const = lambda i: (0, 0)  # weights/biases resident across the batch grid

    in_specs = [
        pl.BlockSpec((tb, state_dim), lambda i: (i, 0)),   # state tile
        pl.BlockSpec((state_dim, HIDDEN), const),          # w1 (bf16)
        pl.BlockSpec((1, HIDDEN), const),                  # b1 (f32)
        pl.BlockSpec((HIDDEN, HIDDEN), const),             # w2 (bf16)
        pl.BlockSpec((1, HIDDEN), const),                  # b2 (f32)
        pl.BlockSpec((HIDDEN, action_dim), const),         # w3 (bf16)
        pl.BlockSpec((1, action_dim), const),              # b3 (f32)
    ]
    # Narrow output block: last dim equals the full array dim -> legal, and
    # kernel writeback is B*action_dim*4 bytes instead of a 128-lane f32 slab.
    out_spec = pl.BlockSpec((tb, action_dim), lambda i: (i, 0))

    out = pl.pallas_call(
        _make_actor_kernel(float(max_action)),
        out_shape=jax.ShapeDtypeStruct((Bp, action_dim), jnp.float32),
        grid_spec=pltpu.PrefetchScalarGridSpec(
            num_scalar_prefetch=0,
            grid=grid,
            in_specs=in_specs,
            out_specs=out_spec,
        ),
        compiler_params=pltpu.CompilerParams(
            dimension_semantics=("parallel",),  # batch tiles shard across v7x's 2 TCs
        ),
    )(state, w1, b1, w2, b2, w3, b3)

    if Bp != B:
        out = out[:B]
    return out


# max_action static -> grid/tile math and kernel closure are compile-time;
# batch padding / row slice fuse into the jitted program (no eager HBM copies).
actor_forward = jax.jit(_actor_forward_impl, static_argnums=(2,))


def init_actor_params(key, state_dim, action_dim):
    """Deterministic synthetic init, PyTorch-Linear-style uniform bounds.

    Weights stored as bf16 [in, out]; biases as f32 [1, out].
    """
    ks = jax.random.split(key, 6)

    def uniform(k, shape, fan_in):
        bound = 1.0 / jnp.sqrt(jnp.float32(fan_in))
        return jax.random.uniform(k, shape, jnp.float32, -bound, bound)

    w1 = uniform(ks[0], (state_dim, HIDDEN), state_dim).astype(jnp.bfloat16)
    b1 = uniform(ks[1], (1, HIDDEN), state_dim)
    w2 = uniform(ks[2], (HIDDEN, HIDDEN), HIDDEN).astype(jnp.bfloat16)
    b2 = uniform(ks[3], (1, HIDDEN), HIDDEN)
    w3 = uniform(ks[4], (HIDDEN, action_dim), HIDDEN).astype(jnp.bfloat16)
    b3 = uniform(ks[5], (1, action_dim), HIDDEN)
    return (w1, b1, w2, b2, w3, b3)


def _reference_forward(state, params, max_action):
    # f32 reference on the same (bf16-quantized) weights.
    w1, b1, w2, b2, w3, b3 = params
    w1, w2, w3 = (w.astype(jnp.float32) for w in (w1, w2, w3))
    a = jnp.maximum(state @ w1 + b1, 0.0)
    a = jnp.maximum(a @ w2 + b2, 0.0)
    return max_action * jnp.tanh(a @ w3 + b3)


if __name__ == "__main__":
    key = jax.random.PRNGKey(0)
    k_params, k_state1, k_state2 = jax.random.split(key, 3)

    state_dim = 16
    action_dim = 8
    max_action = 2.0
    params = init_actor_params(k_params, state_dim, action_dim)

    # small batch: single grid step, no padding
    state_small = jax.random.normal(k_state1, (8, state_dim), jnp.float32)
    out_small = jax.block_until_ready(actor_forward(state_small, params, max_action))
    ref_small = _reference_forward(state_small, params, max_action)
    assert out_small.shape == (8, action_dim)
    assert jnp.allclose(out_small, ref_small, atol=5e-2, rtol=5e-2)

    # larger batch: 2 parallel tiles of 304 rows (pads 600 -> 608, not 1024)
    state_big = jax.random.normal(k_state2, (600, state_dim), jnp.float32)
    out_big = jax.block_until_ready(actor_forward(state_big, params, max_action))
    ref_big = _reference_forward(state_big, params, max_action)
    assert out_big.shape == (600, action_dim)
    assert jnp.allclose(out_big, ref_big, atol=5e-2, rtol=5e-2)

    print("KERNEL_OK")
</pallas_src>

<mosaic_0001>
module attributes {stable_mosaic.version = 11 : i64} {
  func.func @actor_kernel(%arg0: i32, %arg1: memref<8x16xf32, #tpu.memory_space<vmem>>, %arg2: memref<16x256xbf16, #tpu.memory_space<vmem>>, %arg3: memref<1x256xf32, #tpu.memory_space<vmem>>, %arg4: memref<256x256xbf16, #tpu.memory_space<vmem>>, %arg5: memref<1x256xf32, #tpu.memory_space<vmem>>, %arg6: memref<256x8xbf16, #tpu.memory_space<vmem>>, %arg7: memref<1x8xf32, #tpu.memory_space<vmem>>, %arg8: memref<8x8xf32, #tpu.memory_space<vmem>>) attributes {dimension_semantics = [#tpu.dimension_semantics<parallel>], iteration_bounds = array<i64: 1>, scalar_prefetch = 0 : i64, scratch_operands = 0 : i64, tpu.core_type = #tpu.core_type<tc>, window_params = [{transform_indices = @transform_0, window_bounds = array<i64: 8, 16>}, {pipeline_mode = #tpu.pipeline_mode<synchronous>, transform_indices = @transform_1, window_bounds = array<i64: 16, 256>}, {pipeline_mode = #tpu.pipeline_mode<synchronous>, transform_indices = @transform_2, window_bounds = array<i64: 1, 256>}, {pipeline_mode = #tpu.pipeline_mode<synchronous>, transform_indices = @transform_3, window_bounds = array<i64: 256, 256>}, {pipeline_mode = #tpu.pipeline_mode<synchronous>, transform_indices = @transform_4, window_bounds = array<i64: 1, 256>}, {pipeline_mode = #tpu.pipeline_mode<synchronous>, transform_indices = @transform_5, window_bounds = array<i64: 256, 8>}, {pipeline_mode = #tpu.pipeline_mode<synchronous>, transform_indices = @transform_6, window_bounds = array<i64: 1, 8>}, {transform_indices = @transform_7, window_bounds = array<i64: 8, 8>}]} {
    %c0 = arith.constant 0 : index
    %c0_0 = arith.constant 0 : index
    %0 = vector.load %arg1[%c0, %c0_0] : memref<8x16xf32, #tpu.memory_space<vmem>>, vector<8x16xf32>
    %1 = arith.truncf %0 : vector<8x16xf32> to vector<8x16xbf16>
    %c0_1 = arith.constant 0 : index
    %c0_2 = arith.constant 0 : index
    %2 = vector.load %arg2[%c0_1, %c0_2] : memref<16x256xbf16, #tpu.memory_space<vmem>>, vector<16x256xbf16>
    %cst = arith.constant dense<0.000000e+00> : vector<8x256xf32>
    %3 = tpu.matmul %1, %2, %cst {dimension_numbers = #tpu.dot_dimension_numbers<[1], [0], [0], [1], [0, 0, 1, 1], [], []>} : vector<8x16xbf16>, vector<16x256xbf16>, vector<8x256xf32> -> vector<8x256xf32>
    %c0_3 = arith.constant 0 : index
    %c0_4 = arith.constant 0 : index
    %4 = vector.load %arg3[%c0_3, %c0_4] : memref<1x256xf32, #tpu.memory_space<vmem>>, vector<1x256xf32>
    %5 = vector.broadcast %4 : vector<1x256xf32> to vector<8x256xf32>
    %6 = arith.addf %3, %5 : vector<8x256xf32>
    %cst_5 = arith.constant 0.000000e+00 : f32
    %7 = vector.broadcast %cst_5 : f32 to vector<8x256xf32>
    %8 = arith.maximumf %6, %7 : vector<8x256xf32>
    %9 = arith.truncf %8 : vector<8x256xf32> to vector<8x256xbf16>
    %c0_6 = arith.constant 0 : index
    %c0_7 = arith.constant 0 : index
    %10 = vector.load %arg4[%c0_6, %c0_7] : memref<256x256xbf16, #tpu.memory_space<vmem>>, vector<256x256xbf16>
    %cst_8 = arith.constant dense<0.000000e+00> : vector<8x256xf32>
    %11 = tpu.matmul %9, %10, %cst_8 {dimension_numbers = #tpu.dot_dimension_numbers<[1], [0], [0], [1], [0, 0, 1, 1], [], []>} : vector<8x256xbf16>, vector<256x256xbf16>, vector<8x256xf32> -> vector<8x256xf32>
    %c0_9 = arith.constant 0 : index
    %c0_10 = arith.constant 0 : index
    %12 = vector.load %arg5[%c0_9, %c0_10] : memref<1x256xf32, #tpu.memory_space<vmem>>, vector<1x256xf32>
    %13 = vector.broadcast %12 : vector<1x256xf32> to vector<8x256xf32>
    %14 = arith.addf %11, %13 : vector<8x256xf32>
    %cst_11 = arith.constant 0.000000e+00 : f32
    %15 = vector.broadcast %cst_11 : f32 to vector<8x256xf32>
    %16 = arith.maximumf %14, %15 : vector<8x256xf32>
    %17 = arith.truncf %16 : vector<8x256xf32> to vector<8x256xbf16>
    %c0_12 = arith.constant 0 : index
    %c0_13 = arith.constant 0 : index
    %18 = vector.load %arg6[%c0_12, %c0_13] : memref<256x8xbf16, #tpu.memory_space<vmem>>, vector<256x8xbf16>
    %cst_14 = arith.constant dense<0.000000e+00> : vector<8x8xf32>
    %19 = tpu.matmul %17, %18, %cst_14 {dimension_numbers = #tpu.dot_dimension_numbers<[1], [0], [0], [1], [0, 0, 1, 1], [], []>} : vector<8x256xbf16>, vector<256x8xbf16>, vector<8x8xf32> -> vector<8x8xf32>
    %c0_15 = arith.constant 0 : index
    %c0_16 = arith.constant 0 : index
    %20 = vector.load %arg7[%c0_15, %c0_16] : memref<1x8xf32, #tpu.memory_space<vmem>>, vector<1x8xf32>
    %21 = vector.broadcast %20 : vector<1x8xf32> to vector<8x8xf32>
    %22 = arith.addf %19, %21 : vector<8x8xf32>
    %23 = math.tanh %22 : vector<8x8xf32>
    %cst_17 = arith.constant 2.000000e+00 : f32
    %24 = vector.broadcast %cst_17 : f32 to vector<8x8xf32>
    %25 = arith.mulf %24, %23 : vector<8x8xf32>
    %c0_18 = arith.constant 0 : index
    %c0_19 = arith.constant 0 : index
    %26 = vector.load %arg8[%c0_18, %c0_19] : memref<8x8xf32, #tpu.memory_space<vmem>>, vector<8x8xf32>
    tpu.vector_store %arg8[%c0_18, %c0_19], %25 {strides = array<i32>} : memref<8x8xf32, #tpu.memory_space<vmem>>, vector<8x8xf32>,
    return
  }
  func.func @transform_0(%arg0: i32) -> (i32, i32) {
    %c0_i32 = arith.constant 0 : i32
    %c0_i32_0 = arith.constant 0 : i32
    return %arg0, %c0_i32 : i32, i32
  }
  func.func @transform_1(%arg0: i32) -> (i32, i32) {
    %c0_i32 = arith.constant 0 : i32
    %c0_i32_0 = arith.constant 0 : i32
    %c0_i32_1 = arith.constant 0 : i32
    return %c0_i32, %c0_i32_0 : i32, i32
  }
  func.func @transform_2(%arg0: i32) -> (i32, i32) {
    %c0_i32 = arith.constant 0 : i32
    %c0_i32_0 = arith.constant 0 : i32
    %c0_i32_1 = arith.constant 0 : i32
    return %c0_i32, %c0_i32_0 : i32, i32
  }
  func.func @transform_3(%arg0: i32) -> (i32, i32) {
    %c0_i32 = arith.constant 0 : i32
    %c0_i32_0 = arith.constant 0 : i32
    %c0_i32_1 = arith.constant 0 : i32
    return %c0_i32, %c0_i32_0 : i32, i32
  }
  func.func @transform_4(%arg0: i32) -> (i32, i32) {
    %c0_i32 = arith.constant 0 : i32
    %c0_i32_0 = arith.constant 0 : i32
    %c0_i32_1 = arith.constant 0 : i32
    return %c0_i32, %c0_i32_0 : i32, i32
  }
  func.func @transform_5(%arg0: i32) -> (i32, i32) {
    %c0_i32 = arith.constant 0 : i32
    %c0_i32_0 = arith.constant 0 : i32
    %c0_i32_1 = arith.constant 0 : i32
    return %c0_i32, %c0_i32_0 : i32, i32
  }
  func.func @transform_6(%arg0: i32) -> (i32, i32) {
    %c0_i32 = arith.constant 0 : i32
    %c0_i32_0 = arith.constant 0 : i32
    %c0_i32_1 = arith.constant 0 : i32
    return %c0_i32, %c0_i32_0 : i32, i32
  }
  func.func @transform_7(%arg0: i32) -> (i32, i32) {
    %c0_i32 = arith.constant 0 : i32
    %c0_i32_0 = arith.constant 0 : i32
    return %arg0, %c0_i32 : i32, i32
  }
}

</mosaic_0001>

<bundles_post_ra>
// kernel: _actor_forward_impl.1
= control target key start
LH: loop header
LB: loop body
LE: loop exit
PB: predicated region body
PF: predicated region fallthrough
CT: control target
= control target key end

     0   :  { %12 = vsyncpa [#allocation3], 0  ;;  %s891_s0 = inlined_call_operand.vmem [shape: f32[8,16], index: 0, kind: input, shape index: {}]   ;;  %s892_s1 = inlined_call_operand.vmem [shape: bf16[16,256], index: 1, kind: input, shape index: {}]   ;;  %s893_s2 = inlined_call_operand.vmem [shape: f32[1,256], index: 2, kind: input, shape index: {}]   ;;  %s894_s3 = inlined_call_operand.hbm [shape: bf16[256,256], index: 3, kind: input, shape index: {}]   ;;  %s895_s4 = inlined_call_operand.vmem [shape: f32[1,256], index: 4, kind: input, shape index: {}]   ;;  %s896_s5 = inlined_call_operand.vmem [shape: bf16[256,8], index: 5, kind: input, shape index: {}]   ;;  %s897_s6 = inlined_call_operand.vmem [shape: f32[1,8], index: 6, kind: input, shape index: {}]   ;;  %s898_s7 = inlined_call_operand.hbm [shape: f32[8,8], index: 7, kind: output, shape index: {}]  }
   0x1   :  { %13 = vsyncpa [#allocation4], 0  ;;  %s756_s24 = smov [#allocation2]   ;;  %s708_s28 = scalar_lea.hbm %s894_s3, 4096 }
   0x2   :  { %s25_s25 = sshll.u32 %s756_s24, 4  ;;  %p709_p0 = scmp.ne.s32.totalorder %s894_s3, %s708_s28  ;;  %s26_s25 = int_to_ptr.vmem [resolvable:$true] %s25_s25 }
   0x3   :  { %p712_p1 = scmp.lt.u32.totalorder %s708_s28, %s894_s3 }
   0x5   :  { %p714_p2 = pnand %p712_p1, %p709_p0 }
   0x7   :  { %717 = shalt.err (!%p714_p2)
}
   0x8   :  { %s718_s10 = scalar_lea.vmem %s26_s25, 4096  ;;  %p723_p4 = scmp.lt.s32.totalorder %s26_s25, %s26_s25 }
   0x9   :  { %p719_p3 = scmp.ne.s32.totalorder %s26_s25, %s718_s10  ;;  %p724_p5 = scmp.lt.s32.totalorder %s718_s10, %s718_s10 }
   0xb   :  { %p725_p6 = por %p724_p5, %p723_p4 }
   0xd   :  { %p726_p7 = pnand %p725_p6, %p719_p3 }
   0xf   :  { %729 = shalt.err (!%p726_p7)
}
  0x10   :  { %s757_s11 = smov 128   ;;  %s758_s12 = smov 8  }
  0x11   :  { %31 = dma.hbm_to_vmem [thread:$0]  %s894_s3, 4096, %s26_s25, [#allocation3], %s757_s11, %s757_s11, %s758_s12  }
  0x12   :  { %752 = dma.done.wait [#allocation3], 4096  }
  0x13   :  { %753 = vsyncadd [#allocation3], 4294963200  ;;  %v759_v0 = vmov 0   ;;  %v639_v1 = vld [vmem:[%s892_s1 + $0x4] ss:$8 sps:$4 sm:$0xff]   ;;  %vm68_vm0 = vcmask 130048   ;;  %v48_v49 = vlaneseq }
  0x14   :  { %104 = vmatprep.mubr.bf16.mxu0 %v759_v0  ;;  %v641_v2 = vld [vmem:[%s892_s1] ss:$8 sps:$4 sm:$0xff]   ;;  %72 = vmatprep.subr.bf16.mxu0 %v639_v1  ;;  %v642_v5 = vld [vmem:[#allocation2 + $0x4] ss:$8 sps:$4 sm:$0xff]   ;;  %v645_v7 = vld [vmem:[#allocation2 + $0x14] ss:$8 sps:$4 sm:$0xff]  }
  0x15   :  { %v42_v3 = vld [vmem:[%s891_s0] sm:$0xff]  ;;  %73 = vmatpush1.bf16.msra.mxu0 %v641_v2  ;;  %321 = vmatprep.subr.bf16.mxu1 %v642_v5  ;;  %v647_v8 = vld [vmem:[#allocation2 + $0x10] ss:$8 sps:$4 sm:$0xff]   ;;  %v651_v11 = vld [vmem:[#allocation2 + $0x34] ss:$8 sps:$4 sm:$0xff]   ;;  %v49_v50 = vshrl.u32 %v48_v49, 7 }
  0x16   :  { %v43_v4 = vpack.c.bf16 %v42_v3, %v42_v3  ;;  %v644_v6 = vld [vmem:[#allocation2] ss:$8 sps:$4 sm:$0xff]   ;;  %v648_v9 = vld [vmem:[#allocation2 + $0x24] ss:$8 sps:$4 sm:$0xff]   ;;  %v653_v12 = vld [vmem:[#allocation2 + $0x30] ss:$8 sps:$4 sm:$0xff]  }
  0x17   :  { %322 = vmatpush1.bf16.msra.mxu1 %v644_v6  ;;  %v650_v10 = vld [vmem:[#allocation2 + $0x20] ss:$8 sps:$4 sm:$0xff]   ;;  %v654_v13 = vld [vmem:[#allocation2 + $0x44] ss:$8 sps:$4 sm:$0xff]   ;;  %v657_v15 = vld [vmem:[#allocation2 + $0x54] ss:$8 sps:$4 sm:$0xff]  }
  0x18   :  { %562 = vmatmul.mubr.msk.bf16.vlgmr.msra.gmra.mrb[0].mxu0 %vm68_vm0, %v43_v4  ;;  %323 = vmatprep.subr.bf16.mxu1 %v645_v7  ;;  %v656_v14 = vld [vmem:[#allocation2 + $0x40] ss:$8 sps:$4 sm:$0xff]   ;;  %v659_v16 = vld [vmem:[#allocation2 + $0x50] ss:$8 sps:$4 sm:$0xff]   ;;  %v660_v17 = vld [vmem:[#allocation2 + $0x64] ss:$8 sps:$4 sm:$0xff]  }
  0x19   :  { %v662_v18 = vld [vmem:[#allocation2 + $0x60] ss:$8 sps:$4 sm:$0xff]   ;;  %v663_v19 = vld [vmem:[#allocation2 + $0x74] ss:$8 sps:$4 sm:$0xff]   ;;  %v665_v20 = vld [vmem:[#allocation2 + $0x70] ss:$8 sps:$4 sm:$0xff]  }
  0x1a   :  { %v666_v21 = vld [vmem:[#allocation2 + $0x84] ss:$8 sps:$4 sm:$0xff]   ;;  %v668_v22 = vld [vmem:[#allocation2 + $0x80] ss:$8 sps:$4 sm:$0xff]   ;;  %v669_v23 = vld [vmem:[#allocation2 + $0x94] ss:$8 sps:$4 sm:$0xff]  }
  0x1b   :  { %324 = vmatpush1.bf16.msra.mxu1 %v647_v8  ;;  %v671_v24 = vld [vmem:[#allocation2 + $0x90] ss:$8 sps:$4 sm:$0xff]   ;;  %v672_v25 = vld [vmem:[#allocation2 + $0xa4] ss:$8 sps:$4 sm:$0xff]   ;;  %v674_v26 = vld [vmem:[#allocation2 + $0xa0] ss:$8 sps:$4 sm:$0xff]  }
  0x1c   :  { %325 = vmatprep.subr.bf16.mxu1 %v648_v9  ;;  %v675_v27 = vld [vmem:[#allocation2 + $0xb4] ss:$8 sps:$4 sm:$0xff]   ;;  %v677_v28 = vld [vmem:[#allocation2 + $0xb0] ss:$8 sps:$4 sm:$0xff]   ;;  %v678_v29 = vld [vmem:[#allocation2 + $0xc4] ss:$8 sps:$4 sm:$0xff]  }
  0x1d   :  { %v680_v30 = vld [vmem:[#allocation2 + $0xc0] ss:$8 sps:$4 sm:$0xff]   ;;  %v681_v31 = vld [vmem:[#allocation2 + $0xd4] ss:$8 sps:$4 sm:$0xff]   ;;  %v683_v32 = vld [vmem:[#allocation2 + $0xd0] ss:$8 sps:$4 sm:$0xff]  }
  0x1e   :  { %v684_v33 = vld [vmem:[#allocation2 + $0xe4] ss:$8 sps:$4 sm:$0xff]   ;;  %v686_v34 = vld [vmem:[#allocation2 + $0xe0] ss:$8 sps:$4 sm:$0xff]   ;;  %v687_v35 = vld [vmem:[#allocation2 + $0xf4] ss:$8 sps:$4 sm:$0xff]  }
  0x1f   :  { %326 = vmatpush1.bf16.msra.mxu1 %v650_v10  ;;  %v689_v36 = vld [vmem:[#allocation2 + $0xf0] ss:$8 sps:$4 sm:$0xff]   ;;  %v690_v37 = vld [vmem:[%s896_s5 + $0x40] sm:$0xff]   ;;  %v692_v39 = vld [vmem:[%s896_s5 + $0x48] sm:$0xff]   ;;  %v50_v51 = vsub.s32 0, %v49_v50  ;;  %v54_v53 = vsub.s32 1, %v49_v50 }
  0x20   :  { %327 = vmatprep.subr.bf16.mxu1 %v651_v11  ;;  %v691_v38 = vld [vmem:[%s896_s5] sm:$0xff]   ;;  %612 = vmatprep.subr.bf16.mxu0 %v690_v37  ;;  %v693_v40 = vld [vmem:[%s896_s5 + $0x8] sm:$0xff]   ;;  %v694_v41 = vld [vmem:[%s896_s5 + $0x50] sm:$0xff]   ;;  %vm543_vm1 = vcmask 64512  }
  0x21   :  { %613 = vmatpush3.bf16.msra.mxu0 %v691_v38  ;;  %v695_v42 = vld [vmem:[%s896_s5 + $0x10] sm:$0xff]   ;;  %v696_v43 = vld [vmem:[%s896_s5 + $0x58] sm:$0xff]   ;;  %v698_v45 = vld [vmem:[%s896_s5 + $0x60] sm:$0xff]  }
  0x22   :  { %614 = vmatprep.subr.bf16.mxu0 %v692_v39  ;;  %v697_v44 = vld [vmem:[%s896_s5 + $0x18] sm:$0xff]   ;;  %v699_v46 = vld [vmem:[%s896_s5 + $0x20] sm:$0xff]   ;;  %v700_v47 = vld [vmem:[%s896_s5 + $0x68] sm:$0xff]  }
  0x23   :  { %328 = vmatpush1.bf16.msra.mxu1 %v653_v12  ;;  %v701_v48 = vld [vmem:[%s896_s5 + $0x28] sm:$0xff]   ;;  %v46_v52 = vld [vmem:[%s893_s2] sm:$0x3]  ;;  %v702_v2 = vld [vmem:[%s896_s5 + $0x70] sm:$0xff]  }
  0x24   :  { %329 = vmatprep.subr.bf16.mxu1 %v654_v13  ;;  %v51_v54 = vrot.slane %v46_v52, %v50_v51  ;;  %v55_v55 = vrot.slane %v46_v52, %v54_v53  ;;  %v703_v3 = vld [vmem:[%s896_s5 + $0x30] sm:$0xff]   ;;  %v704_v4 = vld [vmem:[%s896_s5 + $0x78] sm:$0xff]   ;;  %v149_v6 = vld [vmem:[%s895_s4] sm:$0x3]  ;;  %s760_s4 = smov [#allocation5]  }
  0x25   :  { %615 = vmatpush3.bf16.msra.mxu0 %v693_v40  ;;  %v705_v5 = vld [vmem:[%s896_s5 + $0x38] sm:$0xff]   ;;  %v154_v7 = vrot.slane %v149_v6, %v50_v51  ;;  %v158_v8 = vrot.slane %v149_v6, %v54_v53  ;;  %s551_s28 = sshll.u32 %s760_s4, 4  ;;  %s552_s28 = int_to_ptr.vmem [resolvable:$true] %s551_s28 }
  0x26   :  { %616 = vmatprep.subr.bf16.mxu0 %v694_v41  ;;  %s730_s29 = scalar_lea.vmem %s552_s28, 128  ;;  %p735_p9 = scmp.lt.s32.totalorder %s552_s28, %s552_s28 }
  0x27   :  { %330 = vmatpush1.bf16.msra.mxu1 %v656_v14  ;;  %p731_p8 = scmp.ne.s32.totalorder %s552_s28, %s730_s29  ;;  %p736_p10 = scmp.lt.s32.totalorder %s730_s29, %s730_s29 }
  0x28   :  { %331 = vmatprep.subr.bf16.mxu1 %v657_v15 }
  0x29   :  { %617 = vmatpush3.bf16.msra.mxu0 %v695_v42  ;;  %p737_p11 = por %p736_p10, %p735_p9 }
  0x2a   :  { %618 = vmatprep.subr.bf16.mxu0 %v696_v43 }
  0x2b   :  { %332 = vmatpush1.bf16.msra.mxu1 %v659_v16  ;;  %p738_p12 = pnand %p737_p11, %p731_p8 }
  0x2c   :  { %333 = vmatprep.subr.bf16.mxu1 %v660_v17 }
  0x2d   :  { %619 = vmatpush3.bf16.msra.mxu0 %v697_v44 }
  0x2e   :  { %620 = vmatprep.subr.bf16.mxu0 %v698_v45 }
  0x2f   :  { %334 = vmatpush1.bf16.msra.mxu1 %v662_v18 }
  0x30   :  { %335 = vmatprep.subr.bf16.mxu1 %v663_v19 }
  0x31   :  { %621 = vmatpush3.bf16.msra.mxu0 %v699_v46 }
  0x32   :  { %622 = vmatprep.subr.bf16.mxu0 %v700_v47 }
  0x33   :  { %336 = vmatpush1.bf16.msra.mxu1 %v665_v20  ;;  %v595_v20 = vld [vmem:[%s897_s6] ss:$0 sm:$0xff] }
  0x34   :  { %337 = vmatprep.subr.bf16.mxu1 %v666_v21 }
  0x35   :  { %623 = vmatpush3.bf16.msra.mxu0 %v701_v48 }
  0x36   :  { %624 = vmatprep.subr.bf16.mxu0 %v702_v2 }
  0x37   :  { %338 = vmatpush1.bf16.msra.mxu1 %v668_v22 }
  0x38   :  { %339 = vmatprep.subr.bf16.mxu1 %v669_v23 }
  0x39   :  { %625 = vmatpush3.bf16.msra.mxu0 %v703_v3 }
  0x3a   :  { %626 = vmatprep.subr.bf16.mxu0 %v704_v4 }
  0x3b   :  { %340 = vmatpush1.bf16.msra.mxu1 %v671_v24 }
  0x3c   :  { %341 = vmatprep.subr.bf16.mxu1 %v672_v25 }
  0x3d   :  { %627 = vmatpush3.bf16.msra.mxu0 %v705_v5 }
  0x3f   :  { %342 = vmatpush1.bf16.msra.mxu1 %v674_v26 }
  0x40   :  { %343 = vmatprep.subr.bf16.mxu1 %v675_v27 }
  0x43   :  { %344 = vmatpush1.bf16.msra.mxu1 %v677_v28 }
  0x44   :  { %345 = vmatprep.subr.bf16.mxu1 %v678_v29 }
  0x47   :  { %346 = vmatpush1.bf16.msra.mxu1 %v680_v30 }
  0x48   :  { %347 = vmatprep.subr.bf16.mxu1 %v681_v31 }
  0x4b   :  { %348 = vmatpush1.bf16.msra.mxu1 %v683_v32 }
  0x4c   :  { %349 = vmatprep.subr.bf16.mxu1 %v684_v33 }
  0x4f   :  { %350 = vmatpush1.bf16.msra.mxu1 %v686_v34 }
  0x50   :  { %351 = vmatprep.subr.bf16.mxu1 %v687_v35 }
  0x53   :  { %352 = vmatpush1.bf16.msra.mxu1 %v689_v36 }
  0xeb   :  { %v106_v56 = vpop.f32.mrb[0].mxu0 }
  0xec   :  { %v107_v57 = vadd.f32 %v106_v56, %v51_v54  ;;  %v108_v58 = vpop.f32.mrb[1].mxu0 }
  0xed   :  { %v109_v59 = vadd.f32 %v108_v58, %v55_v55  ;;  %v110_v60 = vpop.f32.mrb[2].mxu0 }
  0xee   :  { %v113_v61 = vmax.f32 %v107_v57, 0.0  ;;  %v111_v62 = vpop.f32.mrb[3].mxu0 }
  0xef   :  { %v114_v63 = vmax.f32 %v109_v59, 0.0 }
  0xf0   :  { %v115_v1 = vpack.c.bf16 %v113_v61, %v113_v61 }
  0xf1   :  { %v116_v0 = vpack.c.bf16 %v114_v63, %v114_v63 }
  0xf3   :  { %353 = vmatprep.mubr.bf16.mxu1 %v116_v0 }
  0xf4   :  { %354 = vmatmul.mubr.bf16.vlgmr.msra.gmra.mrb[0].mxu1 %v115_v1 }
 0x1c7   :  { %v355_v9 = vpop.f32.mrb[0].mxu1 }
 0x1c8   :  { %v356_v10 = vadd.f32 %v355_v9, %v154_v7  ;;  %v357_v11 = vpop.f32.mrb[1].mxu1 }
 0x1c9   :  { %v358_v12 = vadd.f32 %v357_v11, %v158_v8  ;;  %v359_v13 = vpop.f32.mrb[2].mxu1 }
 0x1ca   :  { %v362_v14 = vmax.f32 %v356_v10, 0.0  ;;  %v360_v15 = vpop.f32.mrb[3].mxu1 }
 0x1cb   :  { %v363_v16 = vmax.f32 %v358_v12, 0.0 }
 0x1cc   :  { %v364_v18 = vpack.c.bf16 %v362_v14, %v362_v14 }
 0x1cd   :  { %v365_v17 = vpack.c.bf16 %v363_v16, %v363_v16 }
 0x1cf   :  { %533 = vmatprep.mubr.bf16.mxu0 %v365_v17 }
 0x1d0   :  { %534 = vmatmul.mubr.bf16.vlgmr.msra.gmra.mrb[4].mxu0 %v364_v18 }
 0x2a3   :  { %v628_v19 = vpop.f32.mrb[4].mxu0 }
 0x2a4   :  { %v629_v21 = vpop.f32.mrb[5].mxu0 }
 0x2a5   :  { %v630_v22 = vadd.f32 %v629_v21, %v628_v19  ;;  %v631_v23 = vpop.f32.mrb[6].mxu0 }
 0x2a6   :  { %v632_v24 = vpop.f32.mrb[7].mxu0 }
 0x2a7   :  { %v536_v25 = vadd.f32 %v630_v22, %v595_v20 }
 0x2a9   :  { %706 = vtanh.f32 %v536_v25 }
 0x2b3   :  { %v707_v26 = vpop.eup %706 }
 0x2b4   :  { %v542_v27 = vmul.f32 2.0, %v707_v26 }
 0x2b6   :  { %544 = vst.msk [vmem:[#allocation5] sm:$0xff] %vm543_vm1, %v542_v27 }
 0x2b7   :  { %741 = shalt.err (!%p738_p12)
}
 0x2b8   :  { %s742_s8 = scalar_lea.hbm %s898_s7, 128 }
 0x2b9   :  { %p743_p13 = scmp.ne.s32.totalorder %s898_s7, %s742_s8  ;;  %p746_p0 = scmp.lt.u32.totalorder %s742_s8, %s898_s7 }
 0x2bb   :  { %p748_p1 = pnand %p746_p0, %p743_p13 }
 0x2bd   :  { %751 = shalt.err (!%p748_p1)
}
 0x2be   :  { %554 = dma.vmem_to_hbm [thread:$0]  %s552_s28, 128, %s898_s7, [#allocation4]  }
 0x2bf   :  { %754 = dma.done.wait [#allocation4], 128  }
 0x2c0   :  { %755 = vsyncadd [#allocation4], 4294967168 }
 0x2c1   :  { %558 = vsyncpa [#allocation3], 1 }
 0x2c2   :  { %559 = vsyncpa [#allocation4], 1 }

</bundles_post_ra>
